<compile_context>
chip_gen: v7x
topology: tpu7x:2x2x1
jax: 0.10.0
libtpu: 0.0.40
codegen_flags: <defaults>
</compile_context>

<pallas_src>
import functools

import jax
import jax.numpy as jnp
from jax.experimental import pallas as pl
from jax.experimental.pallas import tpu as pltpu

_LANES = 128  # lane-dense output width (>= 2 * output_size)


def _round_up(n, m):
    return ((n + m - 1) // m) * m


# --------------------------------------------------------------------------
# Kernel
# --------------------------------------------------------------------------
def _agent_kernel(
    x_ref,                # [TB, I]
    w1_ref, b1_ref,       # a:                         [I, H], [1, H]
    w2_ref, b2_ref,       # [a1@a2 | b]:               [H, O+H], [1, O+H]
    w3_ref, b3_ref,       # [[I_O,0,0],[0,b1@b2,0]]:   [O+H, 128], [1, 128]
    out_ref,              # lane-dense packed probs:   [TB, 128]
    *, output_size,
):
    O = output_size
    cdt = w1_ref.dtype          # MXU input dtype (f32 or bf16)
    f32 = jnp.float32

    x = x_ref[...]

    # output_a = relu(a(x))
    oa = jnp.maximum(
        jnp.dot(x, w1_ref[...], preferred_element_type=f32) + b1_ref[...], 0.0)

    # Fused: [first-head logits | second-head pre-activation]   -> [TB, O+H]
    hb = jnp.dot(oa.astype(cdt), w2_ref[...],
                 preferred_element_type=f32) + b2_ref[...]

    # ReLU only on the second-head half (lane mask; first O lanes are logits).
    col_hb = jax.lax.broadcasted_iota(jnp.int32, hb.shape, 1)
    hb = jnp.where(col_hb < O, hb, jnp.maximum(hb, 0.0))

    # Block-diagonal fold: identity passthrough of the first-head logits,
    # (b1@b2) for the second head, zero-padded to 128 lanes so the final
    # store is a full, unmasked 128-lane vst.                    -> [TB, 128]
    logits = jnp.dot(hb.astype(cdt), w3_ref[...],
                     preferred_element_type=f32) + b3_ref[...]

    # Segmented softmax over lane groups [0, O) and [O, 2O); pad lanes -> 0.
    col = jax.lax.broadcasted_iota(jnp.int32, logits.shape, 1)
    in_first = col < O
    in_second = jnp.logical_and(col >= O, col < 2 * O)
    m1 = jnp.max(jnp.where(in_first, logits, -jnp.inf), axis=-1, keepdims=True)
    m2 = jnp.max(jnp.where(in_second, logits, -jnp.inf), axis=-1, keepdims=True)
    m = jnp.where(in_first, m1, m2)
    e = jnp.exp(logits - m)
    s1 = jnp.sum(jnp.where(in_first, e, 0.0), axis=-1, keepdims=True)
    s2 = jnp.sum(jnp.where(in_second, e, 0.0), axis=-1, keepdims=True)
    s = jnp.where(in_first, s1, s2)
    probs = e / s
    out_ref[...] = jnp.where(col < 2 * O, probs, 0.0).astype(out_ref.dtype)


# --------------------------------------------------------------------------
# Weight folding (6 Linears -> 3 fused matrices)
# --------------------------------------------------------------------------
def _fold_params(params, compute_dtype):
    cdt = jnp.dtype(compute_dtype)
    f32 = jnp.float32
    H = params["a_w"].shape[1]
    O = params["a2_w"].shape[1]

    # Bias-free linear-linear chains: a_1 -> a_2 and b_1 -> b_2.
    a12_w = params["a1_w"] @ params["a2_w"]                        # [H, O]
    a12_b = params["a1_b"] @ params["a2_w"] + params["a2_b"]       # [1, O]
    b12_w = params["b1_w"] @ params["b2_w"]                        # [H, O]
    b12_b = params["b1_b"] @ params["b2_w"] + params["b2_b"]       # [1, O]

    w1 = params["a_w"].astype(cdt)                                 # [I, H]
    b1 = params["a_b"].astype(f32)                                 # [1, H]
    w2 = jnp.concatenate([a12_w, params["b_w"]], axis=1).astype(cdt)   # [H, O+H]
    b2 = jnp.concatenate([a12_b, params["b_b"]], axis=1).astype(f32)   # [1, O+H]

    # Third matmul: pass first-head logits through an identity block, apply
    # b1@b2 to the second head, zero-pad columns to 128 lanes.
    w3 = jnp.zeros((O + H, _LANES), f32)
    w3 = w3.at[:O, :O].set(jnp.eye(O, dtype=f32))
    w3 = w3.at[O:, O:2 * O].set(b12_w)
    b3 = jnp.zeros((1, _LANES), f32).at[:, O:2 * O].set(b12_b)
    return w1, b1, w2, b2, w3.astype(cdt), b3


# --------------------------------------------------------------------------
# Wrapper
# --------------------------------------------------------------------------
@functools.partial(jax.jit, static_argnames=("block_b", "compute_dtype"))
def modified_agent_forward(x, params, *, block_b=1024, compute_dtype=jnp.float32):
    """x: [B, input_size] f32; params: dict of weights [in,out] / biases [1,out].

    Returns (first, second), each [B, output_size] f32.
    block_b is the batch-tile sweep knob (1024 default; ~2048 cap on v5e,
    up to ~4096 on v6e/v7x). compute_dtype=jnp.bfloat16 halves the x/weight
    HBM stream on v6e/v7x (accumulation + softmax stay f32) but will not meet
    the tight f32 reference tolerance.
    """
    B, I = x.shape
    H = params["a_w"].shape[1]
    O = params["a2_w"].shape[1]
    assert 2 * O <= _LANES, "output packing assumes 2*output_size <= 128"
    cdt = jnp.dtype(compute_dtype)
    f32 = jnp.float32

    w1, b1, w2, b2, w3, b3 = _fold_params(params, cdt)
    x = x.astype(cdt)

    # Batch tiling: at least 2 tiles when B > 8 (feeds both TCs on v7x via
    # dimension_semantics), capped at block_b rows. The last block may be
    # ragged; Pallas masks its out-of-bounds reads/writes, so no pad copy.
    if B <= 8:
        tb = _round_up(max(B, 1), 8)
    else:
        tb = max(8, min(block_b, _round_up(-(-B // 2), 8)))
    grid = (pl.cdiv(B, tb),)

    full = lambda i: (0, 0)   # weights/biases: one resident block for all tiles
    kernel = functools.partial(_agent_kernel, output_size=O)

    out = pl.pallas_call(
        kernel,
        out_shape=jax.ShapeDtypeStruct((B, _LANES), f32),
        grid=grid,
        in_specs=[
            pl.BlockSpec((tb, I), lambda i: (i, 0)),                      # x
            pl.BlockSpec((I, H), full), pl.BlockSpec((1, H), full),       # a
            pl.BlockSpec((H, O + H), full), pl.BlockSpec((1, O + H), full),
            pl.BlockSpec((O + H, _LANES), full), pl.BlockSpec((1, _LANES), full),
        ],
        out_specs=pl.BlockSpec((tb, _LANES), lambda i: (i, 0)),           # packed
        compiler_params=pltpu.CompilerParams(
            dimension_semantics=("parallel",),       # shard batch tiles (v7x)
            vmem_limit_bytes=64 * 1024 * 1024,       # headroom for big tiles
        ),
    )(x, w1, b1, w2, b2, w3, b3)

    return out[:, :O], out[:, O:2 * O]


# --------------------------------------------------------------------------
# References & init
# --------------------------------------------------------------------------
def init_params(key, input_size, hidden_size, output_size):
    """PyTorch-Linear-style uniform init; weights stored [in, out]."""
    dims = {
        "a": (input_size, hidden_size),
        "a1": (hidden_size, hidden_size),
        "a2": (hidden_size, output_size),
        "b": (hidden_size, hidden_size),
        "b1": (hidden_size, hidden_size),
        "b2": (hidden_size, output_size),
    }
    params = {}
    for name, (fan_in, fan_out) in dims.items():
        key, kw, kb = jax.random.split(key, 3)
        bound = 1.0 / (fan_in ** 0.5)
        params[f"{name}_w"] = jax.random.uniform(
            kw, (fan_in, fan_out), jnp.float32, -bound, bound)
        params[f"{name}_b"] = jax.random.uniform(
            kb, (1, fan_out), jnp.float32, -bound, bound)
    return params


def reference_forward(x, p):
    """Pure-JAX reference mirroring the PyTorch forward (unfused)."""
    output_a = jax.nn.relu(x @ p["a_w"] + p["a_b"])
    h = output_a @ p["a1_w"] + p["a1_b"]
    h = h @ p["a2_w"] + p["a2_b"]
    first = jax.nn.softmax(h, axis=-1)
    g = jax.nn.relu(jax.nn.relu(output_a) @ p["b_w"] + p["b_b"])
    g = g @ p["b1_w"] + p["b1_b"]
    second = jax.nn.softmax(g @ p["b2_w"] + p["b2_b"], axis=-1)
    return first, second


def folded_reference(x, p):
    """Pure-JAX reference of the exact folded math the kernel performs."""
    O = p["a2_w"].shape[1]
    w1, b1, w2, b2, w3, b3 = _fold_params(p, jnp.float32)
    oa = jax.nn.relu(x @ w1 + b1)
    hb = oa @ w2 + b2
    hb = jnp.concatenate([hb[:, :O], jax.nn.relu(hb[:, O:])], axis=1)
    logits = hb @ w3 + b3
    return (jax.nn.softmax(logits[:, :O], axis=-1),
            jax.nn.softmax(logits[:, O:2 * O], axis=-1))


# --------------------------------------------------------------------------
if __name__ == "__main__":
    input_size, hidden_size, output_size = 16, 32, 8
    batch = 8

    key = jax.random.PRNGKey(0)
    key, kx = jax.random.split(key)
    x = jax.random.normal(kx, (batch, input_size), jnp.float32)
    params = init_params(key, input_size, hidden_size, output_size)

    def check(first, second, xv, tag):
        # Tight check against the folded-math reference (same math as kernel).
        ff, fs = folded_reference(xv, params)
        assert jnp.allclose(first, ff, atol=1e-4, rtol=1e-4), f"{tag}: folded first"
        assert jnp.allclose(second, fs, atol=1e-4, rtol=1e-4), f"{tag}: folded second"
        # Looser check against the unfused PyTorch-equivalent reference: the
        # a1@a2 / b1@b2 prefold legitimately reorders float rounding and the
        # TPU default matmul precision may use reduced-precision passes; with
        # full f32 matmul precision the observed gap is ~1e-6.
        rf, rs = reference_forward(xv, params)
        assert jnp.allclose(first, rf, atol=2e-3), f"{tag}: unfused first"
        assert jnp.allclose(second, rs, atol=2e-3), f"{tag}: unfused second"

    # Small-batch run (single tile).
    first, second = modified_agent_forward(x, params)
    jax.block_until_ready((first, second))
    check(first, second, x, "small")

    # Multi-tile run: >=2 grid steps, ragged last block (no pad copy).
    key, kx2 = jax.random.split(key)
    x2 = jax.random.normal(kx2, (200, input_size), jnp.float32)
    f2, s2 = modified_agent_forward(x2, params, block_b=64)
    jax.block_until_ready((f2, s2))
    check(f2, s2, x2, "multi-tile")

    print("KERNEL_OK")
</pallas_src>

<mosaic_0001>
module attributes {stable_mosaic.version = 11 : i64} {
  func.func @_agent_kernel(%arg0: i32, %arg1: memref<8x16xf32, #tpu.memory_space<vmem>>, %arg2: memref<16x32xf32, #tpu.memory_space<vmem>>, %arg3: memref<1x32xf32, #tpu.memory_space<vmem>>, %arg4: memref<32x40xf32, #tpu.memory_space<vmem>>, %arg5: memref<1x40xf32, #tpu.memory_space<vmem>>, %arg6: memref<40x128xf32, #tpu.memory_space<vmem>>, %arg7: memref<1x128xf32, #tpu.memory_space<vmem>>, %arg8: memref<8x128xf32, #tpu.memory_space<vmem>>) attributes {dimension_semantics = [#tpu.dimension_semantics<parallel>], iteration_bounds = array<i64: 1>, scalar_prefetch = 0 : i64, scratch_operands = 0 : i64, tpu.core_type = #tpu.core_type<tc>, window_params = [{transform_indices = @transform_0, window_bounds = array<i64: 8, 16>}, {pipeline_mode = #tpu.pipeline_mode<synchronous>, transform_indices = @transform_1, window_bounds = array<i64: 16, 32>}, {pipeline_mode = #tpu.pipeline_mode<synchronous>, transform_indices = @transform_2, window_bounds = array<i64: 1, 32>}, {pipeline_mode = #tpu.pipeline_mode<synchronous>, transform_indices = @transform_3, window_bounds = array<i64: 32, 40>}, {pipeline_mode = #tpu.pipeline_mode<synchronous>, transform_indices = @transform_4, window_bounds = array<i64: 1, 40>}, {pipeline_mode = #tpu.pipeline_mode<synchronous>, transform_indices = @transform_5, window_bounds = array<i64: 40, 128>}, {pipeline_mode = #tpu.pipeline_mode<synchronous>, transform_indices = @transform_6, window_bounds = array<i64: 1, 128>}, {transform_indices = @transform_7, window_bounds = array<i64: 8, 128>}]} {
    %c0 = arith.constant 0 : index
    %c0_0 = arith.constant 0 : index
    %0 = vector.load %arg1[%c0, %c0_0] : memref<8x16xf32, #tpu.memory_space<vmem>>, vector<8x16xf32>
    %c0_1 = arith.constant 0 : index
    %c0_2 = arith.constant 0 : index
    %1 = vector.load %arg2[%c0_1, %c0_2] : memref<16x32xf32, #tpu.memory_space<vmem>>, vector<16x32xf32>
    %cst = arith.constant dense<0.000000e+00> : vector<8x32xf32>
    %2 = tpu.matmul %0, %1, %cst {dimension_numbers = #tpu.dot_dimension_numbers<[1], [0], [0], [1], [0, 0, 1, 1], [], []>} : vector<8x16xf32>, vector<16x32xf32>, vector<8x32xf32> -> vector<8x32xf32>
    %c0_3 = arith.constant 0 : index
    %c0_4 = arith.constant 0 : index
    %3 = vector.load %arg3[%c0_3, %c0_4] : memref<1x32xf32, #tpu.memory_space<vmem>>, vector<1x32xf32>
    %4 = vector.broadcast %3 : vector<1x32xf32> to vector<8x32xf32>
    %5 = arith.addf %2, %4 : vector<8x32xf32>
    %cst_5 = arith.constant 0.000000e+00 : f32
    %6 = vector.broadcast %cst_5 : f32 to vector<8x32xf32>
    %7 = arith.maximumf %5, %6 : vector<8x32xf32>
    %c0_6 = arith.constant 0 : index
    %c0_7 = arith.constant 0 : index
    %8 = vector.load %arg4[%c0_6, %c0_7] : memref<32x40xf32, #tpu.memory_space<vmem>>, vector<32x40xf32>
    %cst_8 = arith.constant dense<0.000000e+00> : vector<8x40xf32>
    %9 = tpu.matmul %7, %8, %cst_8 {dimension_numbers = #tpu.dot_dimension_numbers<[1], [0], [0], [1], [0, 0, 1, 1], [], []>} : vector<8x32xf32>, vector<32x40xf32>, vector<8x40xf32> -> vector<8x40xf32>
    %c0_9 = arith.constant 0 : index
    %c0_10 = arith.constant 0 : index
    %10 = vector.load %arg5[%c0_9, %c0_10] : memref<1x40xf32, #tpu.memory_space<vmem>>, vector<1x40xf32>
    %11 = vector.broadcast %10 : vector<1x40xf32> to vector<8x40xf32>
    %12 = arith.addf %9, %11 : vector<8x40xf32>
    %13 = tpu.iota {dimensions = array<i32: 1>} : vector<8x40xi32>
    %c8_i32 = arith.constant 8 : i32
    %14 = vector.broadcast %c8_i32 : i32 to vector<8x40xi32>
    %15 = arith.cmpi slt, %13, %14 : vector<8x40xi32>
    %cst_11 = arith.constant 0.000000e+00 : f32
    %16 = vector.broadcast %cst_11 : f32 to vector<8x40xf32>
    %17 = arith.maximumf %12, %16 : vector<8x40xf32>
    %18 = arith.select %15, %12, %17 : vector<8x40xi1>, vector<8x40xf32>
    %c0_12 = arith.constant 0 : index
    %c0_13 = arith.constant 0 : index
    %19 = vector.load %arg6[%c0_12, %c0_13] : memref<40x128xf32, #tpu.memory_space<vmem>>, vector<40x128xf32>
    %cst_14 = arith.constant dense<0.000000e+00> : vector<8x128xf32>
    %20 = tpu.matmul %18, %19, %cst_14 {dimension_numbers = #tpu.dot_dimension_numbers<[1], [0], [0], [1], [0, 0, 1, 1], [], []>} : vector<8x40xf32>, vector<40x128xf32>, vector<8x128xf32> -> vector<8x128xf32>
    %c0_15 = arith.constant 0 : index
    %c0_16 = arith.constant 0 : index
    %21 = vector.load %arg7[%c0_15, %c0_16] : memref<1x128xf32, #tpu.memory_space<vmem>>, vector<1x128xf32>
    %22 = vector.broadcast %21 : vector<1x128xf32> to vector<8x128xf32>
    %23 = arith.addf %20, %22 : vector<8x128xf32>
    %24 = tpu.iota {dimensions = array<i32: 1>} : vector<8x128xi32>
    %c8_i32_17 = arith.constant 8 : i32
    %25 = vector.broadcast %c8_i32_17 : i32 to vector<8x128xi32>
    %26 = arith.cmpi slt, %24, %25 : vector<8x128xi32>
    %c8_i32_18 = arith.constant 8 : i32
    %27 = vector.broadcast %c8_i32_18 : i32 to vector<8x128xi32>
    %28 = arith.cmpi sge, %24, %27 : vector<8x128xi32>
    %c16_i32 = arith.constant 16 : i32
    %29 = vector.broadcast %c16_i32 : i32 to vector<8x128xi32>
    %30 = arith.cmpi slt, %24, %29 : vector<8x128xi32>
    %31 = arith.andi %28, %30 : vector<8x128xi1>
    %cst_19 = arith.constant 0xFF800000 : f32
    %32 = vector.broadcast %cst_19 : f32 to vector<8x128xf32>
    %33 = arith.select %26, %23, %32 : vector<8x128xi1>, vector<8x128xf32>
    %cst_20 = arith.constant dense<0xFF800000> : vector<8xf32>
    %34 = vector.multi_reduction <maximumf>, %33, %cst_20 [1] : vector<8x128xf32> to vector<8xf32>
    %35 = vector.shape_cast %34 : vector<8xf32> to vector<8x1xf32>
    %cst_21 = arith.constant 0xFF800000 : f32
    %36 = vector.broadcast %cst_21 : f32 to vector<8x128xf32>
    %37 = arith.select %31, %23, %36 : vector<8x128xi1>, vector<8x128xf32>
    %cst_22 = arith.constant dense<0xFF800000> : vector<8xf32>
    %38 = vector.multi_reduction <maximumf>, %37, %cst_22 [1] : vector<8x128xf32> to vector<8xf32>
    %39 = vector.shape_cast %38 : vector<8xf32> to vector<8x1xf32>
    %40 = vector.shape_cast %35 : vector<8x1xf32> to vector<8x1xf32>
    %41 = vector.broadcast %40 : vector<8x1xf32> to vector<8x128xf32>
    %42 = vector.shape_cast %39 : vector<8x1xf32> to vector<8x1xf32>
    %43 = vector.broadcast %42 : vector<8x1xf32> to vector<8x128xf32>
    %44 = arith.select %26, %41, %43 : vector<8x128xi1>, vector<8x128xf32>
    %45 = arith.subf %23, %44 : vector<8x128xf32>
    %46 = math.exp %45 : vector<8x128xf32>
    %cst_23 = arith.constant 0.000000e+00 : f32
    %47 = vector.broadcast %cst_23 : f32 to vector<8x128xf32>
    %48 = arith.select %26, %46, %47 : vector<8x128xi1>, vector<8x128xf32>
    %cst_24 = arith.constant dense<0.000000e+00> : vector<8xf32>
    %49 = vector.multi_reduction <add>, %48, %cst_24 [1] : vector<8x128xf32> to vector<8xf32>
    %50 = vector.shape_cast %49 : vector<8xf32> to vector<8x1xf32>
    %cst_25 = arith.constant 0.000000e+00 : f32
    %51 = vector.broadcast %cst_25 : f32 to vector<8x128xf32>
    %52 = arith.select %31, %46, %51 : vector<8x128xi1>, vector<8x128xf32>
    %cst_26 = arith.constant dense<0.000000e+00> : vector<8xf32>
    %53 = vector.multi_reduction <add>, %52, %cst_26 [1] : vector<8x128xf32> to vector<8xf32>
    %54 = vector.shape_cast %53 : vector<8xf32> to vector<8x1xf32>
    %55 = vector.shape_cast %50 : vector<8x1xf32> to vector<8x1xf32>
    %56 = vector.broadcast %55 : vector<8x1xf32> to vector<8x128xf32>
    %57 = vector.shape_cast %54 : vector<8x1xf32> to vector<8x1xf32>
    %58 = vector.broadcast %57 : vector<8x1xf32> to vector<8x128xf32>
    %59 = arith.select %26, %56, %58 : vector<8x128xi1>, vector<8x128xf32>
    %60 = arith.divf %46, %59 : vector<8x128xf32>
    %c16_i32_27 = arith.constant 16 : i32
    %61 = vector.broadcast %c16_i32_27 : i32 to vector<8x128xi32>
    %62 = arith.cmpi slt, %24, %61 : vector<8x128xi32>
    %cst_28 = arith.constant 0.000000e+00 : f32
    %63 = vector.broadcast %cst_28 : f32 to vector<8x128xf32>
    %64 = arith.select %62, %60, %63 : vector<8x128xi1>, vector<8x128xf32>
    %c0_29 = arith.constant 0 : index
    %c0_30 = arith.constant 0 : index
    %65 = vector.load %arg8[%c0_29, %c0_30] : memref<8x128xf32, #tpu.memory_space<vmem>>, vector<8x128xf32>
    tpu.vector_store %arg8[%c0_29, %c0_30], %64 {strides = array<i32>} : memref<8x128xf32, #tpu.memory_space<vmem>>, vector<8x128xf32>,
    return
  }
  func.func @transform_0(%arg0: i32) -> (i32, i32) {
    %c0_i32 = arith.constant 0 : i32
    %c0_i32_0 = arith.constant 0 : i32
    return %arg0, %c0_i32 : i32, i32
  }
  func.func @transform_1(%arg0: i32) -> (i32, i32) {
    %c0_i32 = arith.constant 0 : i32
    %c0_i32_0 = arith.constant 0 : i32
    %c0_i32_1 = arith.constant 0 : i32
    return %c0_i32, %c0_i32_0 : i32, i32
  }
  func.func @transform_2(%arg0: i32) -> (i32, i32) {
    %c0_i32 = arith.constant 0 : i32
    %c0_i32_0 = arith.constant 0 : i32
    %c0_i32_1 = arith.constant 0 : i32
    return %c0_i32, %c0_i32_0 : i32, i32
  }
  func.func @transform_3(%arg0: i32) -> (i32, i32) {
    %c0_i32 = arith.constant 0 : i32
    %c0_i32_0 = arith.constant 0 : i32
    %c0_i32_1 = arith.constant 0 : i32
    return %c0_i32, %c0_i32_0 : i32, i32
  }
  func.func @transform_4(%arg0: i32) -> (i32, i32) {
    %c0_i32 = arith.constant 0 : i32
    %c0_i32_0 = arith.constant 0 : i32
    %c0_i32_1 = arith.constant 0 : i32
    return %c0_i32, %c0_i32_0 : i32, i32
  }
  func.func @transform_5(%arg0: i32) -> (i32, i32) {
    %c0_i32 = arith.constant 0 : i32
    %c0_i32_0 = arith.constant 0 : i32
    %c0_i32_1 = arith.constant 0 : i32
    return %c0_i32, %c0_i32_0 : i32, i32
  }
  func.func @transform_6(%arg0: i32) -> (i32, i32) {
    %c0_i32 = arith.constant 0 : i32
    %c0_i32_0 = arith.constant 0 : i32
    %c0_i32_1 = arith.constant 0 : i32
    return %c0_i32, %c0_i32_0 : i32, i32
  }
  func.func @transform_7(%arg0: i32) -> (i32, i32) {
    %c0_i32 = arith.constant 0 : i32
    %c0_i32_0 = arith.constant 0 : i32
    return %arg0, %c0_i32 : i32, i32
  }
}

</mosaic_0001>

<bundles_post_ra>
// kernel: modified_agent_forward.1
= control target key start
LH: loop header
LB: loop body
LE: loop exit
PB: predicated region body
PF: predicated region fallthrough
CT: control target
= control target key end

     0   :  { %12 = vsyncpa [#allocation3], 0  ;;  %s854_s0 = inlined_call_operand.hbm [shape: f32[8,16], index: 0, kind: input, shape index: {}]   ;;  %s855_s1 = inlined_call_operand.hbm [shape: f32[16,32], index: 1, kind: input, shape index: {}]   ;;  %s856_s2 = inlined_call_operand.hbm [shape: f32[1,32], index: 2, kind: input, shape index: {}]   ;;  %s857_s3 = inlined_call_operand.hbm [shape: f32[32,40], index: 3, kind: input, shape index: {}]   ;;  %s858_s4 = inlined_call_operand.hbm [shape: f32[1,40], index: 4, kind: input, shape index: {}]   ;;  %s859_s5 = inlined_call_operand.hbm [shape: f32[40,128], index: 5, kind: input, shape index: {}]   ;;  %s860_s6 = inlined_call_operand.hbm [shape: f32[1,128], index: 6, kind: input, shape index: {}]   ;;  %s861_s7 = inlined_call_operand.hbm [shape: f32[8,128], index: 7, kind: output, shape index: {}]  }
   0x1   :  { %13 = vsyncpa [#allocation6], 0 }
   0x2   :  { %14 = vsyncpa [#allocation9], 0 }
   0x3   :  { %15 = vsyncpa [#allocation12], 0 }
   0x4   :  { %16 = vsyncpa [#allocation4], 0  ;;  %s686_s24 = smov [#allocation5]   ;;  %s500_s28 = scalar_lea.hbm %s855_s1, 256 }
   0x5   :  { %s32_s25 = sshll.u32 %s686_s24, 4  ;;  %p501_p0 = scmp.ne.s32.totalorder %s855_s1, %s500_s28  ;;  %s33_s25 = int_to_ptr.vmem [resolvable:$true] %s32_s25 }
   0x6   :  { %p504_p1 = scmp.lt.u32.totalorder %s500_s28, %s855_s1 }
   0x8   :  { %p506_p2 = pnand %p504_p1, %p501_p0 }
   0xa   :  { %509 = shalt.err (!%p506_p2)
}
   0xb   :  { %s510_s10 = scalar_lea.vmem %s33_s25, 256  ;;  %p515_p4 = scmp.lt.s32.totalorder %s33_s25, %s33_s25 }
   0xc   :  { %p511_p3 = scmp.ne.s32.totalorder %s33_s25, %s510_s10  ;;  %p516_p5 = scmp.lt.s32.totalorder %s510_s10, %s510_s10 }
   0xe   :  { %p517_p6 = por %p516_p5, %p515_p4 }
  0x10   :  { %p518_p7 = pnand %p517_p6, %p511_p3 }
  0x12   :  { %521 = shalt.err (!%p518_p7)
}
  0x13   :  { %s687_s11 = smov 128   ;;  %s688_s12 = smov 8  }
  0x14   :  { %38 = dma.hbm_to_vmem [thread:$0]  %s855_s1, 256, %s33_s25, [#allocation6], %s687_s11, %s687_s11, %s688_s12  }
  0x15   :  { %s689_s15 = smov [#allocation8]   ;;  %s690_s17 = smov [#allocation11]  }
  0x16   :  { %s54_s16 = sshll.u32 %s689_s15, 4  ;;  %s76_s18 = sshll.u32 %s690_s17, 4  ;;  %s55_s16 = int_to_ptr.vmem [resolvable:$true] %s54_s16  ;;  %s77_s18 = int_to_ptr.vmem [resolvable:$true] %s76_s18 }
  0x17   :  { %s522_s21 = scalar_lea.hbm %s857_s3, 512 }
  0x18   :  { %p523_p8 = scmp.ne.s32.totalorder %s857_s3, %s522_s21  ;;  %p526_p9 = scmp.lt.u32.totalorder %s522_s21, %s857_s3 }
  0x1a   :  { %p528_p10 = pnand %p526_p9, %p523_p8 }
  0x1c   :  { %531 = shalt.err (!%p528_p10)
}
  0x1d   :  { %s532_s1 = scalar_lea.vmem %s55_s16, 512  ;;  %p537_p12 = scmp.lt.s32.totalorder %s55_s16, %s55_s16 }
  0x1e   :  { %p533_p11 = scmp.ne.s32.totalorder %s55_s16, %s532_s1  ;;  %p538_p13 = scmp.lt.s32.totalorder %s532_s1, %s532_s1 }
  0x20   :  { %p539_p0 = por %p538_p13, %p537_p12 }
  0x22   :  { %p540_p1 = pnand %p539_p0, %p533_p11 }
  0x24   :  { %543 = shalt.err (!%p540_p1)
}
  0x25   :  { %60 = dma.hbm_to_vmem [thread:$0]  %s857_s3, 512, %s55_s16, [#allocation9], %s687_s11, %s687_s11, %s688_s12  }
  0x26   :  { %s544_s30 = scalar_lea.hbm %s859_s5, 640 }
  0x27   :  { %p545_p2 = scmp.ne.s32.totalorder %s859_s5, %s544_s30  ;;  %p548_p3 = scmp.lt.u32.totalorder %s544_s30, %s859_s5 }
  0x29   :  { %p550_p4 = pnand %p548_p3, %p545_p2 }
  0x2b   :  { %553 = shalt.err (!%p550_p4)
}
  0x2c   :  { %s554_s14 = scalar_lea.vmem %s77_s18, 640  ;;  %p559_p6 = scmp.lt.s32.totalorder %s77_s18, %s77_s18 }
  0x2d   :  { %p555_p5 = scmp.ne.s32.totalorder %s77_s18, %s554_s14  ;;  %p560_p7 = scmp.lt.s32.totalorder %s554_s14, %s554_s14 }
  0x2f   :  { %p561_p8 = por %p560_p7, %p559_p6 }
  0x31   :  { %p562_p9 = pnand %p561_p8, %p555_p5 }
  0x33   :  { %565 = shalt.err (!%p562_p9)
}
  0x34   :  { %82 = dma.hbm_to_vmem [thread:$0]  %s859_s5, 640, %s77_s18, [#allocation12], %s687_s11, %s687_s11, %s688_s12  }
  0x35   :  { %s691_s16 = smov [#allocation2]   ;;  %s692_s19 = smov [#allocation7]  }
  0x36   :  { %s23_s17 = sshll.u32 %s691_s16, 4  ;;  %s45_s20 = sshll.u32 %s692_s19, 4  ;;  %s24_s17 = int_to_ptr.vmem [resolvable:$true] %s23_s17  ;;  %s46_s20 = int_to_ptr.vmem [resolvable:$true] %s45_s20 }
  0x37   :  { %s566_s23 = scalar_lea.hbm %s854_s0, 128 }
  0x38   :  { %p567_p10 = scmp.ne.s32.totalorder %s854_s0, %s566_s23  ;;  %p570_p11 = scmp.lt.u32.totalorder %s566_s23, %s854_s0 }
  0x3a   :  { %p572_p12 = pnand %p570_p11, %p567_p10 }
  0x3c   :  { %575 = shalt.err (!%p572_p12)
}
  0x3d   :  { %s576_s5 = scalar_lea.vmem %s24_s17, 128  ;;  %p581_p0 = scmp.lt.s32.totalorder %s24_s17, %s24_s17 }
  0x3e   :  { %p577_p13 = scmp.ne.s32.totalorder %s24_s17, %s576_s5  ;;  %p582_p1 = scmp.lt.s32.totalorder %s576_s5, %s576_s5 }
  0x40   :  { %p583_p2 = por %p582_p1, %p581_p0 }
  0x42   :  { %p584_p3 = pnand %p583_p2, %p577_p13 }
  0x44   :  { %587 = shalt.err (!%p584_p3)
}
  0x45   :  { %26 = dma.hbm_to_vmem [thread:$0]  %s854_s0, 128, %s24_s17, [#allocation3]  }
  0x46   :  { %s588_s28 = scalar_lea.hbm %s856_s2, 16 }
  0x47   :  { %p589_p4 = scmp.ne.s32.totalorder %s856_s2, %s588_s28  ;;  %p592_p5 = scmp.lt.u32.totalorder %s588_s28, %s856_s2 }
  0x49   :  { %p594_p6 = pnand %p592_p5, %p589_p4 }
  0x4b   :  { %597 = shalt.err (!%p594_p6)
}
  0x4c   :  { %s598_s10 = scalar_lea.vmem %s46_s20, 16  ;;  %s602_s13 = scalar_lea.vmem %s46_s20, 32 }
  0x4d   :  { %p599_p7 = scmp.ne.s32.totalorder %s46_s20, %s598_s10  ;;  %p603_p8 = scmp.lt.s32.totalorder %s46_s20, %s46_s20 }
  0x4e   :  { %p604_p9 = scmp.lt.s32.totalorder %s602_s13, %s598_s10 }
  0x50   :  { %p605_p10 = por %p604_p9, %p603_p8 }
  0x52   :  { %p606_p11 = pnand %p605_p10, %p599_p7 }
  0x54   :  { %609 = shalt.err (!%p606_p11)
}
  0x55   :  { %48 = dma.hbm_to_vmem [thread:$0]  %s856_s2, 16, %s46_s20, [#allocation6]  }
  0x56   :  { %s693_s3 = smov [#allocation10]   ;;  %s694_s16 = smov [#allocation13]  }
  0x57   :  { %s67_s15 = sshll.u32 %s693_s3, 4  ;;  %s89_s17 = sshll.u32 %s694_s16, 4  ;;  %s68_s15 = int_to_ptr.vmem [resolvable:$true] %s67_s15  ;;  %s90_s17 = int_to_ptr.vmem [resolvable:$true] %s89_s17 }
  0x58   :  { %s610_s22 = scalar_lea.hbm %s858_s4, 16 }
  0x59   :  { %p611_p12 = scmp.ne.s32.totalorder %s858_s4, %s610_s22  ;;  %p614_p13 = scmp.lt.u32.totalorder %s610_s22, %s858_s4 }
  0x5b   :  { %p616_p0 = pnand %p614_p13, %p611_p12 }
  0x5d   :  { %619 = shalt.err (!%p616_p0)
}
  0x5e   :  { %s620_s2 = scalar_lea.vmem %s68_s15, 16  ;;  %s624_s20 = scalar_lea.vmem %s68_s15, 32 }
  0x5f   :  { %p621_p1 = scmp.ne.s32.totalorder %s68_s15, %s620_s2  ;;  %p625_p2 = scmp.lt.s32.totalorder %s68_s15, %s68_s15 }
  0x60   :  { %p626_p3 = scmp.lt.s32.totalorder %s624_s20, %s620_s2 }
  0x62   :  { %p627_p4 = por %p626_p3, %p625_p2 }
  0x64   :  { %p628_p5 = pnand %p627_p4, %p621_p1 }
  0x66   :  { %631 = shalt.err (!%p628_p5)
}
  0x67   :  { %70 = dma.hbm_to_vmem [thread:$0]  %s858_s4, 16, %s68_s15, [#allocation9]  }
  0x68   :  { %s632_s18 = scalar_lea.hbm %s860_s6, 16 }
  0x69   :  { %p633_p6 = scmp.ne.s32.totalorder %s860_s6, %s632_s18  ;;  %p636_p7 = scmp.lt.u32.totalorder %s632_s18, %s860_s6 }
  0x6b   :  { %p638_p8 = pnand %p636_p7, %p633_p6 }
  0x6d   :  { %641 = shalt.err (!%p638_p8)
}
  0x6e   :  { %s642_s8 = scalar_lea.vmem %s90_s17, 16  ;;  %s646_s9 = scalar_lea.vmem %s90_s17, 32 }
  0x6f   :  { %p643_p9 = scmp.ne.s32.totalorder %s90_s17, %s642_s8  ;;  %p647_p10 = scmp.lt.s32.totalorder %s90_s17, %s90_s17 }
  0x70   :  { %p648_p11 = scmp.lt.s32.totalorder %s646_s9, %s642_s8 }
  0x72   :  { %p649_p12 = por %p648_p11, %p647_p10 }
  0x74   :  { %p650_p13 = pnand %p649_p12, %p643_p9 }
  0x76   :  { %653 = shalt.err (!%p650_p13)
}
  0x77   :  { %92 = dma.hbm_to_vmem [thread:$0]  %s860_s6, 16, %s90_s17, [#allocation12]  }
  0x78   :  { %676 = dma.done.wait [#allocation3], 128  }
  0x79   :  { %677 = vsyncadd [#allocation3], 4294967168 }
  0x7a   :  { %678 = dma.done.wait [#allocation6], 272  }
  0x7b   :  { %679 = vsyncadd [#allocation6], 4294967024 }
  0x7c   :  { %680 = dma.done.wait [#allocation9], 528  }
  0x7d   :  { %681 = vsyncadd [#allocation9], 4294966768 }
  0x7e   :  { %682 = dma.done.wait [#allocation12], 656  }
  0x7f   :  { %683 = vsyncadd [#allocation12], 4294966640  ;;  %v695_v0 = vmov 0.0|0.0   ;;  %vm696_vm0 = vmmov 0   ;;  %v697_v1 = vmov 0.0   ;;  %v115_v2 = vld [vmem:[#allocation5] sm:$0xff]  ;;  %v284_v24 = vlaneseq }
  0x80   :  { %468 = vmatprep.subr.bf16.mxu1 %v695_v0  ;;  %441 = vmatprep.mubr.msk.f32.mxu1 %vm696_vm0, %v697_v1  ;;  %v116_v3 = vld [vmem:[#allocation5 + $0x8] sm:$0xff]  ;;  %v199_v5 = vld [vmem:[#allocation8] sm:$0xff]  ;;  %v200_v6 = vld [vmem:[#allocation8 + $0x8] sm:$0xff]  ;;  %vm124_vm1 = vcmask 130048   ;;  %vm210_vm2 = vcmask 261120   ;;  %vm301_vm4 = vcmask 326656  }
  0x81   :  { %477 = vmatprep.subr.bf16.mxu0 %v695_v0  ;;  %465 = vmatprep.mubr.msk.f32.mxu0 %vm696_vm0, %v697_v1  ;;  %v469_v4 = vpack.c.bf16 %v116_v3, %v115_v2  ;;  %v114_v7 = vld [vmem:[#allocation2] sm:$0xff]  ;;  %v472_v8 = vpack.c.bf16 %v200_v6, %v199_v5  ;;  %v201_v9 = vld [vmem:[#allocation8 + $0x10] sm:$0xff]  ;;  %v202_v10 = vld [vmem:[#allocation8 + $0x18] sm:$0xff]  ;;  %v285_v26 = vand.u32 127, %v284_v24  ;;  %s698_s6 = smov [#allocation14]  }
  0x82   :  { %v475_v11 = vpack.c.bf16 %v202_v10, %v201_v9  ;;  %v289_v12 = vld [vmem:[#allocation11] sm:$0xff]  ;;  %v290_v13 = vld [vmem:[#allocation11 + $0x8] sm:$0xff]  ;;  %v417_v15 = vld [vmem:[#allocation7] ss:$0 sm:$0xff]  ;;  %s405_s13 = sshll.u32 %s698_s6, 4  ;;  %s406_s13 = int_to_ptr.vmem [resolvable:$true] %s405_s13 }
  0x83   :  { %470 = vmatpush3.bf16.msra.mxu1 %v469_v4  ;;  %v478_v14 = vpack.c.bf16 %v290_v13, %v289_v12  ;;  %v291_v20 = vld [vmem:[#allocation11 + $0x10] sm:$0xff]  ;;  %v292_v21 = vld [vmem:[#allocation11 + $0x18] sm:$0xff]  ;;  %v293_v23 = vld [vmem:[#allocation11 + $0x20] sm:$0xff]  ;;  %vm286_vm3 = vcmp.lt.s32.totalorder %v285_v26, 8  ;;  %vm375_vm5 = vcmp.ge.s32.totalorder %v285_v26, 8  ;;  %vm376_vm6 = vcmp.lt.s32.totalorder %v285_v26, 16  ;;  %p659_p1 = scmp.lt.s32.totalorder %s406_s13, %s406_s13 }
  0x84   :  { %471 = vmatprep.subr.bf16.mxu1 %v695_v0  ;;  %v481_v22 = vpack.c.bf16 %v292_v21, %v291_v20  ;;  %v419_v25 = vld [vmem:[#allocation10] ss:$0 sm:$0xff]  ;;  %v421_v32 = vld [vmem:[#allocation13] ss:$0 sm:$0xff]  ;;  %vm377_vm7 = vmand %vm375_vm5, %vm376_vm6  ;;  %s654_s0 = scalar_lea.vmem %s406_s13, 128 }
  0x85   :  { %479 = vmatpush3.bf16.msra.mxu0 %v478_v14  ;;  %p655_p0 = scmp.ne.s32.totalorder %s406_s13, %s654_s0  ;;  %p660_p2 = scmp.lt.s32.totalorder %s654_s0, %s654_s0 }
  0x86   :  { %442 = vmatmul.mubr.msk.f32.vlgmr.msra.gmra.mrb[0].mxu1 %vm124_vm1, %v114_v7  ;;  %480 = vmatprep.subr.bf16.mxu0 %v695_v0 }
  0x87   :  { %473 = vmatpush3.bf16.msra.mxu1 %v472_v8  ;;  %452 = vmatprep.mubr.msk.f32.mxu1 %vm696_vm0, %v697_v1  ;;  %p661_p3 = por %p660_p2, %p659_p1 }
  0x88   :  { %474 = vmatprep.subr.bf16.mxu1 %v695_v0 }
  0x89   :  { %482 = vmatpush3.bf16.msra.mxu0 %v481_v22  ;;  %p662_p4 = pnand %p661_p3, %p655_p0 }
  0x8a   :  { %463 = vmatprep.subr.mxu0 %v697_v1 }
  0x8b   :  { %476 = vmatpush3.bf16.msra.mxu1 %v475_v11 }
  0x8d   :  { %464 = vmatpush3.msra.mxu0 %v293_v23 }
 0x159   :  { %v194_v16 = vpop.f32.mrb[0].mxu1 }
 0x15a   :  { %v195_v17 = vadd.f32 %v417_v15, %v194_v16  ;;  %v443_v18 = vpop.f32.mrb[1].mxu1 }
 0x15c   :  { %v198_v19 = vmax.f32 %v195_v17, 0.0 }
 0x15e   :  { %453 = vmatmul.mubr.msk.f32.vlgmr.msra.gmra.mrb[2].mxu1 %vm210_vm2, %v198_v19 }
 0x231   :  { %v280_v27 = vpop.f32.mrb[2].mxu1 }
 0x232   :  { %v281_v28 = vadd.f32 %v419_v25, %v280_v27  ;;  %v454_v29 = vpop.f32.mrb[3].mxu1 }
 0x234   :  { %v287_v30 = vmax.f32 %v281_v28, 0.0 }
 0x236   :  { %v288_v31 = vsel %vm286_vm3, %v281_v28, %v287_v30 }
 0x237   :  { %466 = vmatmul.mubr.msk.f32.vlgmr.msra.gmra.mrb[0].mxu0 %vm301_vm4, %v288_v31 }
 0x30a   :  { %v371_v33 = vpop.f32.mrb[0].mxu0 }
 0x30b   :  { %v372_v34 = vadd.f32 %v421_v32, %v371_v33  ;;  %v467_v35 = vpop.f32.mrb[1].mxu0 }
 0x30d   :  { %v378_v36 = vsel %vm286_vm3, %v372_v34, -inf  ;;  %v381_v37 = vsel %vm377_vm7, %v372_v34, -inf }
 0x30e   :  { %379 = vmax.xlane.f32.xlu0 %v378_v36 }
 0x312   :  { %382 = vmax.xlane.f32.xlu0 %v381_v37 }
 0x39b   :  { %v380_v38 = vpop.xlane.xlu0 %379 }
 0x39f   :  { %v383_v39 = vpop.xlane.xlu0 %382 }
 0x3a0   :  { %v384_v40 = vsel %vm286_vm3, %v380_v38, %v383_v39 }
 0x3a1   :  { %v385_v41 = vsub.f32 %v372_v34, %v384_v40 }
 0x3a3   :  { %v386_v42 = vmul.f32 1.442695, %v385_v41 }
 0x3a5   :  { %496 = vpow2.f32 %v386_v42 }
 0x3af   :  { %v497_v43 = vpop.eup %496 }
 0x3b0   :  { %v388_v44 = vsel %vm286_vm3, %v497_v43, 0.0  ;;  %v391_v45 = vsel %vm377_vm7, %v497_v43, 0.0 }
 0x3b1   :  { %389 = vadd.xlane.f32.xlu1 %v388_v44 }
 0x3b5   :  { %392 = vadd.xlane.f32.xlu1 %v391_v45 }
 0x43e   :  { %v390_v46 = vpop.xlane.xlu1 %389 }
 0x442   :  { %v393_v47 = vpop.xlane.xlu1 %392 }
 0x443   :  { %v394_v48 = vsel %vm286_vm3, %v390_v46, %v393_v47 }
 0x444   :  { %498 = vrcp.f32 %v394_v48 }
 0x44e   :  { %v499_v49 = vpop.eup %498 }
 0x44f   :  { %v396_v50 = vmul.f32 %v499_v49, %v497_v43 }
 0x451   :  { %v397_v51 = vsel %vm376_vm6, %v396_v50, 0.0 }
 0x452   :  { %398 = vst [vmem:[#allocation14] sm:$0xff] %v397_v51 }
 0x453   :  { %665 = shalt.err (!%p662_p4)
}
 0x454   :  { %s666_s15 = scalar_lea.hbm %s861_s7, 128 }
 0x455   :  { %p667_p5 = scmp.ne.s32.totalorder %s861_s7, %s666_s15  ;;  %p670_p6 = scmp.lt.u32.totalorder %s666_s15, %s861_s7 }
 0x457   :  { %p672_p7 = pnand %p670_p6, %p667_p5 }
 0x459   :  { %675 = shalt.err (!%p672_p7)
}
 0x45a   :  { %408 = dma.vmem_to_hbm [thread:$0]  %s406_s13, 128, %s861_s7, [#allocation4]  }
 0x45b   :  { %684 = dma.done.wait [#allocation4], 128  }
 0x45c   :  { %685 = vsyncadd [#allocation4], 4294967168 }
 0x45d   :  { %412 = vsyncpa [#allocation3], 1 }
 0x45e   :  { %413 = vsyncpa [#allocation6], 1 }
 0x45f   :  { %414 = vsyncpa [#allocation9], 1 }
 0x460   :  { %415 = vsyncpa [#allocation12], 1 }
 0x461   :  { %416 = vsyncpa [#allocation4], 1 }

</bundles_post_ra>
